<compile_context>
chip_gen: v6e
topology: v6e:2x2x1
jax: 0.10.0
libtpu: 0.0.40
codegen_flags: <defaults>
</compile_context>

<pallas_src>
import functools
import math

import jax
import jax.numpy as jnp
from jax.experimental import pallas as pl
from jax.experimental.pallas import tpu as pltpu


def _gelu_exact(x):
    # F.gelu default (exact, erf-based); erf runs on the EUP slot.
    return 0.5 * x * (1.0 + jax.lax.erf(x * (2.0 ** -0.5)))


# --------------------------------------------------------------------------
# Kernels
# --------------------------------------------------------------------------

def _ffn_kernel_resident(x_ref, w1_ref, b1_ref, w2_ref, b2_ref, out_ref, *,
                         compute_dtype):
    """Fast path: W1/W2 fully resident in VMEM; one row tile per grid step."""
    h = jnp.dot(x_ref[...], w1_ref[...], preferred_element_type=jnp.float32)
    h = h + b1_ref[...].astype(jnp.float32)
    h = _gelu_exact(h)                               # exact GELU in f32
    # TODO(synk): nn.Dropout is identity at inference; training mask omitted.
    o = jnp.dot(h.astype(compute_dtype), w2_ref[...],
                preferred_element_type=jnp.float32)
    out_ref[...] = (o + b2_ref[...].astype(jnp.float32)).astype(out_ref.dtype)


def _ffn_kernel_tiled(x_ref, w1_ref, b1_ref, w2_ref, b2_ref, out_ref, acc_ref,
                      *, compute_dtype):
    """K-tiled path: d_ff chunked on grid axis 1, persistent f32 accumulator."""
    f = pl.program_id(1)

    @pl.when(f == 0)
    def _init():
        acc_ref[...] = jnp.zeros_like(acc_ref)

    h = jnp.dot(x_ref[...], w1_ref[...], preferred_element_type=jnp.float32)
    h = h + b1_ref[...].astype(jnp.float32)
    h = _gelu_exact(h)                               # exact GELU in f32
    # TODO(synk): dropout omitted (inference).
    acc_ref[...] += jnp.dot(h.astype(compute_dtype), w2_ref[...],
                            preferred_element_type=jnp.float32)

    @pl.when(f == pl.num_programs(1) - 1)
    def _finalize():
        out_ref[...] = (acc_ref[...]
                        + b2_ref[...].astype(jnp.float32)).astype(out_ref.dtype)


# --------------------------------------------------------------------------
# Wrapper
# --------------------------------------------------------------------------

def _vmem_capacity_bytes():
    try:
        return int(pltpu.get_tpu_info().vmem_capacity_bytes)
    except Exception:
        return 64 << 20          # conservative fallback (v7x per-TensorCore)


def _round_up(x, m):
    return -(-x // m) * m


def _pick_row_tile(R, row_tile):
    """Row tile: full when tiny; >= 2 blocks (megacore) once there is work."""
    if R <= 256:
        return R                                     # full-dim block is legal
    if R <= row_tile:
        return max(8, _round_up(-(-R // 2), 8))      # split so both TCs get work
    return max(8, row_tile - row_tile % 8)


def _pick_ff_tile(d_ff, cap):
    """Return (TF, padded d_ff).  TF is a multiple of 128 unless TF == d_ff."""
    cap = max(128, cap - cap % 128)
    if d_ff <= cap:
        return d_ff, d_ff
    for t in range(cap, 127, -128):
        if d_ff % t == 0:
            return t, d_ff
    d_ff_pad = _round_up(d_ff, 128)
    for t in range(cap, 127, -128):
        if d_ff_pad % t == 0:
            return t, d_ff_pad
    return 128, d_ff_pad


def positionwise_feed_forward(x, w1, b1, w2, b2, *,
                              compute_dtype=jnp.bfloat16,
                              row_tile=None, ff_tile_cap=None,
                              force_ff_tiling=False):
    """y = gelu(x @ w1 + b1) @ w2 + b2.

    x: [..., d_model]; w1: [d_model, d_ff]; w2: [d_ff, d_model]
    (i.e. the torch Linear weights transposed).  compute_dtype controls the
    MXU operand dtype (accumulation / bias / GELU stay in f32).
    """
    orig_shape = x.shape
    D = orig_shape[-1]
    d_ff = w1.shape[1]
    R = math.prod(orig_shape[:-1])

    compute_dtype = jnp.dtype(compute_dtype)
    out_dtype = x.dtype

    # Chip-adaptive budget: v5e/v6e have 128 MiB VMEM, v7x 64 MiB per TC.
    vmem_cap = _vmem_capacity_bytes()
    big_vmem = vmem_cap >= (96 << 20)
    vmem_budget = int(vmem_cap * 0.80)               # headroom below the ceiling
    if row_tile is None:
        row_tile = 512 if big_vmem else 256
    if ff_tile_cap is None:
        ff_tile_cap = 2048 if big_vmem else 1024

    # Pre-cast operands once in the wrapper (no per-step casts in the kernel).
    x2 = x.reshape(R, D).astype(compute_dtype)
    w1c = w1.astype(compute_dtype)
    w2c = w2.astype(compute_dtype)
    b1r = b1.reshape(1, d_ff).astype(jnp.float32)
    b2r = b2.reshape(1, D).astype(jnp.float32)

    csz = compute_dtype.itemsize
    osz = jnp.dtype(out_dtype).itemsize

    TM = _pick_row_tile(R, row_tile)
    n_row = pl.cdiv(R, TM)

    cost_flops = 4 * R * D * d_ff                    # two matmuls
    cost_transc = R * d_ff                           # erf

    # ------------------ fast path: weights resident in VMEM ------------------
    resident_bytes = (
        2 * (D * d_ff + d_ff * D) * csz              # W1 + W2 (conservative x2 buffers)
        + 2 * TM * D * (csz + osz)                   # double-buffered x / out tiles
        + TM * d_ff * (4 + csz)                      # f32 intermediate + cast copy
        + (d_ff + D) * 4                             # biases
        + (4 << 20))                                 # compiler scratch headroom
    use_resident = (not force_ff_tiling) and resident_bytes <= vmem_budget

    if use_resident:
        bytes_accessed = int(R * D * (csz + osz)
                             + 2 * D * d_ff * csz    # weights read once
                             + (d_ff + D) * 4)
        kernel = functools.partial(_ffn_kernel_resident,
                                   compute_dtype=compute_dtype)
        out = pl.pallas_call(
            kernel,
            out_shape=jax.ShapeDtypeStruct((R, D), out_dtype),
            grid_spec=pltpu.PrefetchScalarGridSpec(
                num_scalar_prefetch=0,
                grid=(n_row,),
                in_specs=[
                    pl.BlockSpec((TM, D), lambda i: (i, 0)),     # x rows
                    pl.BlockSpec((D, d_ff), lambda i: (0, 0)),   # W1 (resident)
                    pl.BlockSpec((1, d_ff), lambda i: (0, 0)),   # b1
                    pl.BlockSpec((d_ff, D), lambda i: (0, 0)),   # W2 (resident)
                    pl.BlockSpec((1, D), lambda i: (0, 0)),      # b2
                ],
                out_specs=pl.BlockSpec((TM, D), lambda i: (i, 0)),
            ),
            compiler_params=pltpu.CompilerParams(
                dimension_semantics=("parallel",),
                vmem_limit_bytes=vmem_budget),
            cost_estimate=pl.CostEstimate(
                flops=cost_flops, transcendentals=cost_transc,
                bytes_accessed=bytes_accessed),
        )(x2, w1c, b1r, w2c, b2r)
        return out.reshape(orig_shape)

    # --------------- K-tiled path: chunk d_ff on reduction axis ---------------
    TF, d_ff_pad = _pick_ff_tile(d_ff, ff_tile_cap)
    if d_ff_pad != d_ff:
        # Exact zero-padding: padded h is gelu(0 + 0) = 0 and padded W2 rows
        # are zero, so padded channels contribute nothing.
        pad = d_ff_pad - d_ff
        w1c = jnp.pad(w1c, ((0, 0), (0, pad)))
        w2c = jnp.pad(w2c, ((0, pad), (0, 0)))
        b1r = jnp.pad(b1r, ((0, 0), (0, pad)))
    n_ff = d_ff_pad // TF

    tiled_bytes = (2 * (TM * D * csz                 # x tile (double buffered)
                        + D * TF * csz               # W1 chunk
                        + TF * D * csz               # W2 chunk
                        + (TF + D) * 4               # bias chunks
                        + TM * D * osz)              # out tile
                   + TM * D * 4                      # f32 accumulator
                   + TM * TF * (4 + csz)             # intermediate + cast copy
                   + (4 << 20))
    vmem_limit = max(min(tiled_bytes, vmem_budget), min(32 << 20, vmem_budget))

    bytes_accessed = int(R * D * (csz + osz)
                         + n_row * 2 * D * d_ff_pad * csz   # weights per row tile
                         + (d_ff_pad + D) * 4)

    kernel = functools.partial(_ffn_kernel_tiled, compute_dtype=compute_dtype)
    out = pl.pallas_call(
        kernel,
        out_shape=jax.ShapeDtypeStruct((R, D), out_dtype),
        grid_spec=pltpu.PrefetchScalarGridSpec(
            num_scalar_prefetch=0,
            grid=(n_row, n_ff),
            in_specs=[
                pl.BlockSpec((TM, D), lambda i, f: (i, 0)),      # x rows
                pl.BlockSpec((D, TF), lambda i, f: (0, f)),      # W1 d_ff-chunk
                pl.BlockSpec((1, TF), lambda i, f: (0, f)),      # b1 d_ff-chunk
                pl.BlockSpec((TF, D), lambda i, f: (f, 0)),      # W2 d_ff-chunk
                pl.BlockSpec((1, D), lambda i, f: (0, 0)),       # b2
            ],
            out_specs=pl.BlockSpec((TM, D), lambda i, f: (i, 0)),
            scratch_shapes=[pltpu.VMEM((TM, D), jnp.float32)],
        ),
        compiler_params=pltpu.CompilerParams(
            dimension_semantics=("parallel", "arbitrary"),
            vmem_limit_bytes=vmem_limit),
        cost_estimate=pl.CostEstimate(
            flops=cost_flops, transcendentals=cost_transc,
            bytes_accessed=bytes_accessed),
    )(x2, w1c, b1r, w2c, b2r)
    return out.reshape(orig_shape)


# ---------------- pure-JAX reference (sanity check) ----------------
def positionwise_feed_forward_ref(x, w1, b1, w2, b2):
    h = _gelu_exact(x.astype(jnp.float32) @ w1 + b1)
    return h @ w2 + b2


if __name__ == "__main__":
    key = jax.random.PRNGKey(0)

    def make(B, M, D, F, s=0.1):
        ks = jax.random.split(key, 5)
        x = jax.random.normal(ks[0], (B, M, D), jnp.float32)
        w1 = s * jax.random.normal(ks[1], (D, F), jnp.float32)   # torch w_1.weight.T
        b1 = s * jax.random.normal(ks[2], (F,), jnp.float32)
        w2 = s * jax.random.normal(ks[3], (F, D), jnp.float32)   # torch w_2.weight.T
        b2 = s * jax.random.normal(ks[4], (D,), jnp.float32)
        return x, w1, b1, w2, b2

    # 1) Tiny module-like shapes, f32 compute, resident fast path, tight tol.
    x, w1, b1, w2, b2 = make(2, 8, 32, 64)
    out = jax.block_until_ready(
        positionwise_feed_forward(x, w1, b1, w2, b2, compute_dtype=jnp.float32))
    ref = positionwise_feed_forward_ref(x, w1, b1, w2, b2)
    if not jnp.allclose(out, ref, rtol=1e-3, atol=1e-3):
        raise AssertionError("resident f32 path mismatch vs reference")

    # 2) Lane-aligned shapes, f32 compute, forced K-tiled reduction path.
    x, w1, b1, w2, b2 = make(2, 128, 128, 512)
    ref = positionwise_feed_forward_ref(x, w1, b1, w2, b2)
    out = jax.block_until_ready(
        positionwise_feed_forward(x, w1, b1, w2, b2, compute_dtype=jnp.float32,
                                  ff_tile_cap=128, force_ff_tiling=True))
    if not jnp.allclose(out, ref, rtol=1e-3, atol=1e-3):
        raise AssertionError("K-tiled f32 path mismatch vs reference")

    # 3) d_ff not a multiple of 128 -> exercises exact zero-padding, K-tiled.
    x, w1, b1, w2, b2 = make(2, 128, 128, 448)
    ref = positionwise_feed_forward_ref(x, w1, b1, w2, b2)
    out = jax.block_until_ready(
        positionwise_feed_forward(x, w1, b1, w2, b2, compute_dtype=jnp.float32,
                                  ff_tile_cap=128, force_ff_tiling=True))
    if not jnp.allclose(out, ref, rtol=1e-3, atol=1e-3):
        raise AssertionError("K-tiled padded-d_ff path mismatch vs reference")

    # 4) Default bf16 MXU operands (production path) -- loose-tolerance smoke.
    x, w1, b1, w2, b2 = make(2, 128, 128, 512)
    ref = positionwise_feed_forward_ref(x, w1, b1, w2, b2)
    out = jax.block_until_ready(positionwise_feed_forward(x, w1, b1, w2, b2))
    if not jnp.allclose(out, ref, rtol=0.1, atol=0.2):
        raise AssertionError("bf16 path mismatch vs reference (loose tolerance)")

    print("KERNEL_OK")
</pallas_src>

<mosaic_0001>
module attributes {stable_mosaic.version = 11 : i64} {
  func.func @_ffn_kernel_resident(%arg0: i32, %arg1: memref<16x32xf32, #tpu.memory_space<vmem>>, %arg2: memref<32x64xf32, #tpu.memory_space<vmem>>, %arg3: memref<1x64xf32, #tpu.memory_space<vmem>>, %arg4: memref<64x32xf32, #tpu.memory_space<vmem>>, %arg5: memref<1x32xf32, #tpu.memory_space<vmem>>, %arg6: memref<16x32xf32, #tpu.memory_space<vmem>>) attributes {dimension_semantics = [#tpu.dimension_semantics<parallel>], iteration_bounds = array<i64: 1>, scalar_prefetch = 0 : i64, scratch_operands = 0 : i64, tpu.core_type = #tpu.core_type<tc>, window_params = [{transform_indices = @transform_0, window_bounds = array<i64: 16, 32>}, {pipeline_mode = #tpu.pipeline_mode<synchronous>, transform_indices = @transform_1, window_bounds = array<i64: 32, 64>}, {pipeline_mode = #tpu.pipeline_mode<synchronous>, transform_indices = @transform_2, window_bounds = array<i64: 1, 64>}, {pipeline_mode = #tpu.pipeline_mode<synchronous>, transform_indices = @transform_3, window_bounds = array<i64: 64, 32>}, {pipeline_mode = #tpu.pipeline_mode<synchronous>, transform_indices = @transform_4, window_bounds = array<i64: 1, 32>}, {transform_indices = @transform_5, window_bounds = array<i64: 16, 32>}]} {
    %c0 = arith.constant 0 : index
    %c0_0 = arith.constant 0 : index
    %0 = vector.load %arg1[%c0, %c0_0] : memref<16x32xf32, #tpu.memory_space<vmem>>, vector<16x32xf32>
    %c0_1 = arith.constant 0 : index
    %c0_2 = arith.constant 0 : index
    %1 = vector.load %arg2[%c0_1, %c0_2] : memref<32x64xf32, #tpu.memory_space<vmem>>, vector<32x64xf32>
    %cst = arith.constant dense<0.000000e+00> : vector<16x64xf32>
    %2 = tpu.matmul %0, %1, %cst {dimension_numbers = #tpu.dot_dimension_numbers<[1], [0], [0], [1], [0, 0, 1, 1], [], []>} : vector<16x32xf32>, vector<32x64xf32>, vector<16x64xf32> -> vector<16x64xf32>
    %c0_3 = arith.constant 0 : index
    %c0_4 = arith.constant 0 : index
    %3 = vector.load %arg3[%c0_3, %c0_4] : memref<1x64xf32, #tpu.memory_space<vmem>>, vector<1x64xf32>
    %4 = vector.broadcast %3 : vector<1x64xf32> to vector<16x64xf32>
    %5 = arith.addf %2, %4 : vector<16x64xf32>
    %cst_5 = arith.constant 5.000000e-01 : f32
    %6 = vector.broadcast %cst_5 : f32 to vector<16x64xf32>
    %7 = arith.mulf %6, %5 : vector<16x64xf32>
    %cst_6 = arith.constant 0.707106769 : f32
    %8 = vector.broadcast %cst_6 : f32 to vector<16x64xf32>
    %9 = arith.mulf %5, %8 : vector<16x64xf32>
    %10 = math.erf %9 : vector<16x64xf32>
    %cst_7 = arith.constant 1.000000e+00 : f32
    %11 = vector.broadcast %cst_7 : f32 to vector<16x64xf32>
    %12 = arith.addf %11, %10 : vector<16x64xf32>
    %13 = arith.mulf %7, %12 : vector<16x64xf32>
    %c0_8 = arith.constant 0 : index
    %c0_9 = arith.constant 0 : index
    %14 = vector.load %arg4[%c0_8, %c0_9] : memref<64x32xf32, #tpu.memory_space<vmem>>, vector<64x32xf32>
    %cst_10 = arith.constant dense<0.000000e+00> : vector<16x32xf32>
    %15 = tpu.matmul %13, %14, %cst_10 {dimension_numbers = #tpu.dot_dimension_numbers<[1], [0], [0], [1], [0, 0, 1, 1], [], []>} : vector<16x64xf32>, vector<64x32xf32>, vector<16x32xf32> -> vector<16x32xf32>
    %c0_11 = arith.constant 0 : index
    %c0_12 = arith.constant 0 : index
    %16 = vector.load %arg5[%c0_11, %c0_12] : memref<1x32xf32, #tpu.memory_space<vmem>>, vector<1x32xf32>
    %17 = vector.broadcast %16 : vector<1x32xf32> to vector<16x32xf32>
    %18 = arith.addf %15, %17 : vector<16x32xf32>
    %c0_13 = arith.constant 0 : index
    %c0_14 = arith.constant 0 : index
    %19 = vector.load %arg6[%c0_13, %c0_14] : memref<16x32xf32, #tpu.memory_space<vmem>>, vector<16x32xf32>
    tpu.vector_store %arg6[%c0_13, %c0_14], %18 {strides = array<i32>} : memref<16x32xf32, #tpu.memory_space<vmem>>, vector<16x32xf32>,
    return
  }
  func.func @transform_0(%arg0: i32) -> (i32, i32) {
    %c0_i32 = arith.constant 0 : i32
    %c0_i32_0 = arith.constant 0 : i32
    return %arg0, %c0_i32 : i32, i32
  }
  func.func @transform_1(%arg0: i32) -> (i32, i32) {
    %c0_i32 = arith.constant 0 : i32
    %c0_i32_0 = arith.constant 0 : i32
    %c0_i32_1 = arith.constant 0 : i32
    return %c0_i32, %c0_i32_0 : i32, i32
  }
  func.func @transform_2(%arg0: i32) -> (i32, i32) {
    %c0_i32 = arith.constant 0 : i32
    %c0_i32_0 = arith.constant 0 : i32
    %c0_i32_1 = arith.constant 0 : i32
    return %c0_i32, %c0_i32_0 : i32, i32
  }
  func.func @transform_3(%arg0: i32) -> (i32, i32) {
    %c0_i32 = arith.constant 0 : i32
    %c0_i32_0 = arith.constant 0 : i32
    %c0_i32_1 = arith.constant 0 : i32
    return %c0_i32, %c0_i32_0 : i32, i32
  }
  func.func @transform_4(%arg0: i32) -> (i32, i32) {
    %c0_i32 = arith.constant 0 : i32
    %c0_i32_0 = arith.constant 0 : i32
    %c0_i32_1 = arith.constant 0 : i32
    return %c0_i32, %c0_i32_0 : i32, i32
  }
  func.func @transform_5(%arg0: i32) -> (i32, i32) {
    %c0_i32 = arith.constant 0 : i32
    %c0_i32_0 = arith.constant 0 : i32
    return %arg0, %c0_i32 : i32, i32
  }
}

</mosaic_0001>

<bundles_post_ra>
// kernel: tpu_custom_call.1
= control target key start
LH: loop header
LB: loop body
LE: loop exit
PB: predicated region body
PF: predicated region fallthrough
CT: control target
= control target key end

     0   :  { %vm34_vm0 = vcmask 261120   ;;  %s410_s0 = inlined_call_operand.vmem [shape: f32[16,32], index: 0, kind: input, shape index: {}]   ;;  %s411_s1 = inlined_call_operand.vmem [shape: f32[32,64], index: 1, kind: input, shape index: {}]   ;;  %s412_s2 = inlined_call_operand.vmem [shape: f32[1,64], index: 2, kind: input, shape index: {}]   ;;  %s413_s3 = inlined_call_operand.vmem [shape: f32[64,32], index: 3, kind: input, shape index: {}]   ;;  %s414_s4 = inlined_call_operand.vmem [shape: f32[1,32], index: 4, kind: input, shape index: {}]   ;;  %s415_s5 = inlined_call_operand.hbm [shape: f32[16,32], index: 5, kind: output, shape index: {}]  }
   0x1   :  { %v26_v0 = vld [vmem:[%s411_s1 + $0x18] sm:$0xff]  ;;  %v25_v1 = vld [vmem:[%s411_s1 + $0x10] sm:$0xff]  ;;  %v21_v2 = vld [vmem:[%s410_s0] sm:$0xff] }
   0x2   :  { %263 = vmatprep.subr.mxu0 %v26_v0  ;;  %v24_v3 = vld [vmem:[%s411_s1 + $0x8] sm:$0xff]  ;;  %271 = vmatprep.mubr.msk.f32.mxu0 %vm34_vm0, %v21_v2 }
   0x3   :  { %264 = vmatpush3.msra.mxu0 %v26_v0 }
   0x4   :  { %10 = vsyncpa [#allocation3], 0  ;;  %265 = vmatprep.subr.mxu0 %v25_v1  ;;  %v23_v4 = vld [vmem:[%s411_s1] sm:$0xff]  ;;  %v22_v5 = vld [vmem:[%s410_s0 + $0x8] sm:$0xff]  ;;  %vm141_vm1 = vcmask 523264   ;;  %s322_s21 = smov [#allocation2]  }
   0x5   :  { %266 = vmatpush3.msra.mxu0 %v25_v1  ;;  %v133_v6 = vld [vmem:[%s413_s3 + $0x38] sm:$0xff]  ;;  %v132_v7 = vld [vmem:[%s413_s3 + $0x30] sm:$0xff]  ;;  %v131_v8 = vld [vmem:[%s413_s3 + $0x28] sm:$0xff]  ;;  %s230_s22 = sshll.u32 %s322_s21, 4  ;;  %s231_s22 = int_to_ptr.vmem [resolvable:$true] %s230_s22 }
   0x6   :  { %267 = vmatprep.subr.mxu0 %v24_v3  ;;  %274 = vmatprep.subr.mxu1 %v133_v6  ;;  %v130_v9 = vld [vmem:[%s413_s3 + $0x20] sm:$0xff]  ;;  %v129_v10 = vld [vmem:[%s413_s3 + $0x18] sm:$0xff]  ;;  %v128_v11 = vld [vmem:[%s413_s3 + $0x10] sm:$0xff]  ;;  %s300_s23 = scalar_lea.vmem %s231_s22, 256  ;;  %p305_p1 = scmp.lt.s32.totalorder %s231_s22, %s231_s22 }
   0x7   :  { %268 = vmatpush3.msra.mxu0 %v24_v3  ;;  %275 = vmatpush3.msra.mxu1 %v133_v6  ;;  %v127_v12 = vld [vmem:[%s413_s3 + $0x8] sm:$0xff]  ;;  %v126_v13 = vld [vmem:[%s413_s3] sm:$0xff]  ;;  %p301_p0 = scmp.ne.s32.totalorder %s231_s22, %s300_s23  ;;  %p306_p2 = scmp.lt.s32.totalorder %s300_s23, %s300_s23 }
   0x8   :  { %269 = vmatprep.subr.mxu0 %v23_v4  ;;  %276 = vmatprep.subr.mxu1 %v132_v7  ;;  %v241_v14 = vld [vmem:[%s412_s2] ss:$0 sm:$0xff] }
   0x9   :  { %270 = vmatpush3.msra.mxu0 %v23_v4  ;;  %277 = vmatpush3.msra.mxu1 %v132_v7  ;;  %v244_v29 = vld [vmem:[%s414_s4] ss:$0 sm:$0xff]  ;;  %p307_p3 = por %p306_p2, %p305_p1 }
   0xa   :  { %272 = vmatmul.mubr.msk.f32.vlgmr.msra.gmra.mxu0 %vm34_vm0, %v22_v5  ;;  %278 = vmatprep.subr.mxu1 %v131_v8 }
   0xb   :  { %279 = vmatpush3.msra.mxu1 %v131_v8  ;;  %p308_p4 = pnand %p307_p3, %p301_p0 }
   0xc   :  { %280 = vmatprep.subr.mxu1 %v130_v9 }
   0xd   :  { %281 = vmatpush3.msra.mxu1 %v130_v9 }
   0xe   :  { %282 = vmatprep.subr.mxu1 %v129_v10 }
   0xf   :  { %283 = vmatpush3.msra.mxu1 %v129_v10 }
  0x10   :  { %284 = vmatprep.subr.mxu1 %v128_v11 }
  0x11   :  { %285 = vmatpush3.msra.mxu1 %v128_v11 }
  0x12   :  { %286 = vmatprep.subr.mxu1 %v127_v12 }
  0x13   :  { %287 = vmatpush3.msra.mxu1 %v127_v12 }
  0x14   :  { %288 = vmatprep.subr.mxu1 %v126_v13 }
  0x15   :  { %289 = vmatpush3.msra.mxu1 %v126_v13 }
  0xca   :  { %v273_v15 = vpop.f32.mrf.mxu0 }
  0xcb   :  { %v113_v16 = vadd.f32 %v273_v15, %v241_v14 }
  0xcc   :  { %v107_v17 = vpop.f32.mrf.mxu0 }
  0xcd   :  { %v119_v18 = vmul.f32 0.70710677, %v113_v16  ;;  %v108_v19 = vadd.f32 %v241_v14, %v107_v17  ;;  %v117_v26 = vmul.f32 0.5, %v113_v16 }
  0xcf   :  { %296 = verf.f32 %v119_v18  ;;  %v118_v20 = vmul.f32 0.70710677, %v108_v19  ;;  %v116_v24 = vmul.f32 0.5, %v108_v19 }
  0xd1   :  { %298 = verf.f32 %v118_v20 }
  0xdc   :  { %v297_v21 = vpop.eup %296 }
  0xdd   :  { %v123_v23 = vadd.f32 1.0, %v297_v21 }
  0xde   :  { %v299_v22 = vpop.eup %298 }
  0xdf   :  { %v122_v25 = vadd.f32 1.0, %v299_v22  ;;  %v125_v28 = vmul.f32 %v123_v23, %v117_v26 }
  0xe1   :  { %v124_v27 = vmul.f32 %v122_v25, %v116_v24 }
  0xe3   :  { %290 = vmatprep.mubr.msk.f32.mxu1 %vm141_vm1, %v124_v27 }
  0xe4   :  { %291 = vmatmul.mubr.msk.f32.vlgmr.msra.gmra.mxu1 %vm141_vm1, %v125_v28 }
 0x1a4   :  { %v292_v30 = vpop.f32.mrf.mxu1 }
 0x1a5   :  { %v220_v31 = vadd.f32 %v292_v30, %v244_v29 }
 0x1a6   :  { %v214_v32 = vpop.f32.mrf.mxu1 }
 0x1a7   :  { %224 = vst.msk [vmem:[#allocation2 + $0x8] sm:$0xff] %vm34_vm0, %v220_v31  ;;  %v215_v33 = vadd.f32 %v244_v29, %v214_v32 }
 0x1a9   :  { %223 = vst.msk [vmem:[#allocation2] sm:$0xff] %vm34_vm0, %v215_v33 }
 0x1aa   :  { %311 = shalt.err (!%p308_p4)
}
 0x1ab   :  { %s323_s24 = smov 128   ;;  %s324_s4 = smov 8  }
 0x1ac   :  { %236 = dma.vmem_to_hbm [thread:$0]  %s231_s22, 256, %s415_s5, [#allocation3], %s323_s24, %s323_s24, %s324_s4  }
 0x1ad   :  { %320 = dma.done.wait [#allocation3], 256  }
 0x1ae   :  { %321 = vsyncadd [#allocation3], 4294967040 }
 0x1af   :  { %240 = vsyncpa [#allocation3], 1 }

</bundles_post_ra>
